<compile_context>
chip_gen: v7x
topology: tpu7x:2x2x1
jax: 0.10.0
libtpu: 0.0.40
codegen_flags: <defaults>
</compile_context>

<pallas_src>
import functools
import math

import jax
import jax.numpy as jnp
import numpy as np
from jax.experimental import pallas as pl
from jax.experimental.pallas import tpu as pltpu

LANE = 128                      # vreg lane width
CHUNK_ROWS = 512                # rows per fori_loop iteration (512x128 f32 = 64 vregs)
TARGET_BLOCK_BYTES = 4 << 20    # per-input, per-block VMEM footprint (native dtype)
MIN_VMEM_LIMIT = 32 << 20       # covers 16 MiB double-buffered inputs + scratch; safe on v5e..v7x


def _rmse_partial_kernel(x_ref, y_ref, o_ref, *, block_rows, chunk_rows, m_rows, needs_mask):
    """Per-block partial sum of squared differences, reduced to (8, LANE) f32."""
    i = pl.program_id(0)
    n_chunks = block_rows // chunk_rows

    def chunk_ssq(c, masked):
        r0 = pl.multiple_of(c * chunk_rows, chunk_rows)
        # Native-dtype loads, f32 math.
        d = (x_ref[pl.ds(r0, chunk_rows), :].astype(jnp.float32)
             - y_ref[pl.ds(r0, chunk_rows), :].astype(jnp.float32))
        if masked:
            # Zero rows past the true row count BEFORE squaring/reduction:
            # overhanging rows of the last block hold unspecified VMEM data.
            row = jax.lax.broadcasted_iota(jnp.int32, (chunk_rows, LANE), 0)
            valid = (i * block_rows + r0 + row) < m_rows
            d = jnp.where(valid, d, jnp.float32(0.0))
        sq = d * d
        # Reduce over the vreg-count axis only: pure VPU adds, stays lane/sublane dense.
        return jnp.sum(sq.reshape(chunk_rows // 8, 8, LANE), axis=0)

    acc0 = jnp.zeros((8, LANE), jnp.float32)

    def unmasked_loop():
        return jax.lax.fori_loop(0, n_chunks, lambda c, a: a + chunk_ssq(c, False), acc0)

    def masked_loop():
        return jax.lax.fori_loop(0, n_chunks, lambda c, a: a + chunk_ssq(c, True), acc0)

    if not needs_mask:
        # No ragged tail anywhere: mask fully elided at trace time.
        o_ref[...] = unmasked_loop()
    else:
        last = pl.num_programs(0) - 1

        @pl.when(i != last)
        def _():
            o_ref[...] = unmasked_loop()

        @pl.when(i == last)
        def _():
            o_ref[...] = masked_loop()


def rmse_loss(x, y, eps=1e-9, block_rows=None):
    assert x.shape == y.shape, "RMSELoss expects same-shaped inputs"
    n = int(np.prod(x.shape))
    if n == 0:
        # torch.mean of an empty tensor is NaN; sqrt(NaN + eps) stays NaN.
        return jnp.float32(jnp.nan)

    x_item = jnp.dtype(x.dtype).itemsize
    y_item = jnp.dtype(y.dtype).itemsize

    if block_rows is None:
        # Bytes-constant block height: keep ~TARGET_BLOCK_BYTES per input block
        # regardless of dtype (f32 -> 8192 rows, bf16 -> 16384 rows).
        block_rows = TARGET_BLOCK_BYTES // (LANE * max(x_item, y_item))
    # Force a multiple of 8 sublanes (user-supplied values included).
    block_rows = max(8, ((int(block_rows) + 7) // 8) * 8)

    xf = x.reshape(-1)  # native dtype; no wrapper-side cast
    yf = y.reshape(-1)

    # Rare fallback: only pad when numel is not a multiple of the lane width.
    # Zero padding contributes 0 to the sum; mean divides by the true count n.
    pad = (-n) % LANE
    if pad:
        xf = jnp.pad(xf, (0, pad))
        yf = jnp.pad(yf, (0, pad))
    m_rows = (n + pad) // LANE

    # Clamp block height for small inputs; keep it a multiple of 8 sublanes.
    tm = min(block_rows, max(8, ((m_rows + 7) // 8) * 8))
    num_blocks = pl.cdiv(m_rows, tm)
    # In-kernel chunk size: divides tm, >= 8 (tm is a multiple of 8), <= 512.
    chunk_rows = math.gcd(tm, CHUNK_ROWS)
    # Static flag: does the last block overhang the array?
    needs_mask = (m_rows % tm) != 0

    x2 = xf.reshape(m_rows, LANE)
    y2 = yf.reshape(m_rows, LANE)

    # Explicit scoped-VMEM limit so the bigger blocks fit even on v5e's 16 MiB
    # default; stays well under v7x's 64 MiB physical per TensorCore.
    block_in_bytes = tm * LANE * (x_item + y_item)
    needed = 2 * block_in_bytes + 2 * (8 * LANE * 4) + (2 << 20)
    vmem_limit = max(needed, MIN_VMEM_LIMIT)

    cost = pl.CostEstimate(
        flops=3 * n,                       # sub, mul, add per element
        transcendentals=0,
        bytes_accessed=n * (x_item + y_item) + num_blocks * 8 * LANE * 4,
    )

    partials = pl.pallas_call(
        functools.partial(
            _rmse_partial_kernel,
            block_rows=tm,
            chunk_rows=chunk_rows,
            m_rows=m_rows,
            needs_mask=needs_mask,
        ),
        out_shape=jax.ShapeDtypeStruct((num_blocks * 8, LANE), jnp.float32),
        grid=(num_blocks,),
        in_specs=[
            pl.BlockSpec((tm, LANE), lambda i: (i, 0)),
            pl.BlockSpec((tm, LANE), lambda i: (i, 0)),
        ],
        out_specs=pl.BlockSpec((8, LANE), lambda i: (i, 0)),
        compiler_params=pltpu.CompilerParams(
            # Each step writes an independent partial -> safe to shard across
            # TensorCores (v7x); neutral on single-TC v5e/v6e.
            dimension_semantics=("parallel",),
            vmem_limit_bytes=vmem_limit,
        ),
        cost_estimate=cost,
    )(x2, y2)

    # Tiny two-level finalize in plain JAX: sum partials, mean, +eps, sqrt.
    mse = jnp.sum(partials) / jnp.float32(n)
    return jnp.sqrt(mse + jnp.float32(eps))


if __name__ == "__main__":
    key = jax.random.PRNGKey(0)
    kx, ky = jax.random.split(key)

    # NCHW-like inputs (RMSELoss / MSELoss reduce over all elements).
    x = jax.random.normal(kx, (2, 4, 16, 16), dtype=jnp.float32)
    y = jax.random.normal(ky, (2, 4, 16, 16), dtype=jnp.float32)

    ref = jnp.sqrt(jnp.mean((x - y) ** 2) + 1e-9)

    # Default (single-block, mask statically elided) path.
    loss = jax.block_until_ready(rmse_loss(x, y, eps=1e-9))
    np.testing.assert_allclose(np.asarray(loss), np.asarray(ref), rtol=1e-5, atol=1e-6)

    # Multi-block grid path, evenly divisible (no mask anywhere).
    loss_mb = jax.block_until_ready(rmse_loss(x, y, eps=1e-9, block_rows=8))
    np.testing.assert_allclose(np.asarray(loss_mb), np.asarray(ref), rtol=1e-5, atol=1e-6)

    # Multi-block grid with a ragged last block (mask confined to last step).
    xm = jax.random.normal(kx, (2, 4, 17, 16), dtype=jnp.float32)  # 2176 = 17 * 128 elems
    ym = jax.random.normal(ky, (2, 4, 17, 16), dtype=jnp.float32)
    ref_m = jnp.sqrt(jnp.mean((xm - ym) ** 2) + 1e-9)
    loss_m = jax.block_until_ready(rmse_loss(xm, ym, eps=1e-9, block_rows=8))
    np.testing.assert_allclose(np.asarray(loss_m), np.asarray(ref_m), rtol=1e-5, atol=1e-6)

    # Ragged element count (not a multiple of 128) exercises pad + masked tail.
    xr = jax.random.normal(kx, (2, 3, 7, 5), dtype=jnp.float32)
    yr = jax.random.normal(ky, (2, 3, 7, 5), dtype=jnp.float32)
    ref_r = jnp.sqrt(jnp.mean((xr - yr) ** 2) + 1e-9)
    loss_r = jax.block_until_ready(rmse_loss(xr, yr, eps=1e-9))
    np.testing.assert_allclose(np.asarray(loss_r), np.asarray(ref_r), rtol=1e-5, atol=1e-6)

    # bf16 inputs stay bf16 on the wire; block height auto-doubles (bytes-constant).
    xb = x.astype(jnp.bfloat16)
    yb = y.astype(jnp.bfloat16)
    ref_b = jnp.sqrt(jnp.mean((xb.astype(jnp.float32) - yb.astype(jnp.float32)) ** 2) + 1e-9)
    loss_b = jax.block_until_ready(rmse_loss(xb, yb, eps=1e-9))
    np.testing.assert_allclose(np.asarray(loss_b), np.asarray(ref_b), rtol=1e-4, atol=1e-5)

    print("KERNEL_OK")
</pallas_src>

<mosaic_0001>
module attributes {stable_mosaic.version = 11 : i64} {
  func.func @_rmse_partial_kernel(%arg0: i32, %arg1: memref<16x128xf32, #tpu.memory_space<vmem>>, %arg2: memref<16x128xf32, #tpu.memory_space<vmem>>, %arg3: memref<8x128xf32, #tpu.memory_space<vmem>>) attributes {dimension_semantics = [#tpu.dimension_semantics<parallel>], iteration_bounds = array<i64: 1>, scalar_prefetch = 0 : i64, scratch_operands = 0 : i64, tpu.core_type = #tpu.core_type<tc>, window_params = [{transform_indices = @transform_0, window_bounds = array<i64: 16, 128>}, {transform_indices = @transform_1, window_bounds = array<i64: 16, 128>}, {transform_indices = @transform_2, window_bounds = array<i64: 8, 128>}]} {
    %cst = arith.constant 0.000000e+00 : f32
    %0 = vector.broadcast %cst : f32 to vector<8x128xf32>
    %c0_i32 = arith.constant 0 : i32
    %c16_i32 = arith.constant 16 : i32
    %1 = arith.muli %c0_i32, %c16_i32 : i32
    %2 = tpu.assume_multiple %1, 16 : i32
    %3 = arith.index_cast %2 : i32 to index
    %c0 = arith.constant 0 : index
    %4 = vector.load %arg1[%3, %c0] : memref<16x128xf32, #tpu.memory_space<vmem>>, vector<16x128xf32>
    %5 = arith.index_cast %2 : i32 to index
    %c0_0 = arith.constant 0 : index
    %6 = vector.load %arg2[%5, %c0_0] : memref<16x128xf32, #tpu.memory_space<vmem>>, vector<16x128xf32>
    %7 = arith.subf %4, %6 : vector<16x128xf32>
    %8 = arith.mulf %7, %7 : vector<16x128xf32>
    %9 = vector.shape_cast %8 : vector<16x128xf32> to vector<2x8x128xf32>
    %cst_1 = arith.constant dense<0.000000e+00> : vector<8x128xf32>
    %10 = vector.multi_reduction <add>, %9, %cst_1 [0] : vector<2x8x128xf32> to vector<8x128xf32>
    %11 = arith.addf %0, %10 : vector<8x128xf32>
    %c1_i32 = arith.constant 1 : i32
    %c0_2 = arith.constant 0 : index
    %c0_3 = arith.constant 0 : index
    %12 = vector.load %arg3[%c0_2, %c0_3] : memref<8x128xf32, #tpu.memory_space<vmem>>, vector<8x128xf32>
    tpu.vector_store %arg3[%c0_2, %c0_3], %11 {strides = array<i32>} : memref<8x128xf32, #tpu.memory_space<vmem>>, vector<8x128xf32>,
    return
  }
  func.func @transform_0(%arg0: i32) -> (i32, i32) {
    %c0_i32 = arith.constant 0 : i32
    %c0_i32_0 = arith.constant 0 : i32
    return %arg0, %c0_i32 : i32, i32
  }
  func.func @transform_1(%arg0: i32) -> (i32, i32) {
    %c0_i32 = arith.constant 0 : i32
    %c0_i32_0 = arith.constant 0 : i32
    return %arg0, %c0_i32 : i32, i32
  }
  func.func @transform_2(%arg0: i32) -> (i32, i32) {
    %c0_i32 = arith.constant 0 : i32
    %c0_i32_0 = arith.constant 0 : i32
    return %arg0, %c0_i32 : i32, i32
  }
}

</mosaic_0001>

<bundles_post_ra>
// kernel: tpu_custom_call.1
= control target key start
LH: loop header
LB: loop body
LE: loop exit
PB: predicated region body
PF: predicated region fallthrough
CT: control target
= control target key end

     0   :  { %7 = vsyncpa [#allocation3], 0  ;;  %s200_s0 = inlined_call_operand.hbm [shape: f32[16,128], index: 0, kind: input, shape index: {}]   ;;  %s201_s1 = inlined_call_operand.hbm [shape: f32[16,128], index: 1, kind: input, shape index: {}]   ;;  %s202_s2 = inlined_call_operand.hbm [shape: f32[8,128], index: 2, kind: output, shape index: {}]  }
   0x1   :  { %8 = vsyncpa [#allocation6], 0 }
   0x2   :  { %9 = vsyncpa [#allocation4], 0  ;;  %s144_s9 = smov [#allocation2]   ;;  %s72_s13 = scalar_lea.hbm %s200_s0, 256 }
   0x3   :  { %s15_s10 = sshll.u32 %s144_s9, 4  ;;  %p73_p0 = scmp.ne.s32.totalorder %s200_s0, %s72_s13  ;;  %s16_s10 = int_to_ptr.vmem [resolvable:$true] %s15_s10 }
   0x4   :  { %p76_p1 = scmp.lt.u32.totalorder %s72_s13, %s200_s0 }
   0x6   :  { %p78_p2 = pnand %p76_p1, %p73_p0 }
   0x8   :  { %81 = shalt.err (!%p78_p2)
}
   0x9   :  { %s82_s18 = scalar_lea.vmem %s16_s10, 256  ;;  %p87_p4 = scmp.lt.s32.totalorder %s16_s10, %s16_s10 }
   0xa   :  { %p83_p3 = scmp.ne.s32.totalorder %s16_s10, %s82_s18  ;;  %p88_p5 = scmp.lt.s32.totalorder %s82_s18, %s82_s18 }
   0xc   :  { %p89_p6 = por %p88_p5, %p87_p4 }
   0xe   :  { %p90_p7 = pnand %p89_p6, %p83_p3 }
  0x10   :  { %93 = shalt.err (!%p90_p7)
}
  0x11   :  { %s145_s19 = smov 128   ;;  %s146_s20 = smov 8  }
  0x12   :  { %21 = dma.hbm_to_vmem [thread:$0]  %s200_s0, 256, %s16_s10, [#allocation3], %s145_s19, %s145_s19, %s146_s20  }
  0x13   :  { %s147_s23 = smov [#allocation5]   ;;  %s94_s27 = scalar_lea.hbm %s201_s1, 256 }
  0x14   :  { %s27_s24 = sshll.u32 %s147_s23, 4  ;;  %p95_p8 = scmp.ne.s32.totalorder %s201_s1, %s94_s27  ;;  %s28_s24 = int_to_ptr.vmem [resolvable:$true] %s27_s24 }
  0x15   :  { %p98_p9 = scmp.lt.u32.totalorder %s94_s27, %s201_s1 }
  0x17   :  { %p100_p10 = pnand %p98_p9, %p95_p8 }
  0x19   :  { %103 = shalt.err (!%p100_p10)
}
  0x1a   :  { %s104_s4 = scalar_lea.vmem %s28_s24, 256  ;;  %p109_p12 = scmp.lt.s32.totalorder %s28_s24, %s28_s24 }
  0x1b   :  { %p105_p11 = scmp.ne.s32.totalorder %s28_s24, %s104_s4  ;;  %p110_p13 = scmp.lt.s32.totalorder %s104_s4, %s104_s4 }
  0x1d   :  { %p111_p0 = por %p110_p13, %p109_p12 }
  0x1f   :  { %p112_p1 = pnand %p111_p0, %p105_p11 }
  0x21   :  { %115 = shalt.err (!%p112_p1)
}
  0x22   :  { %33 = dma.hbm_to_vmem [thread:$0]  %s201_s1, 256, %s28_s24, [#allocation6], %s145_s19, %s145_s19, %s146_s20  }
  0x23   :  { %138 = dma.done.wait [#allocation3], 256  }
  0x24   :  { %139 = vsyncadd [#allocation3], 4294967040 }
  0x25   :  { %140 = dma.done.wait [#allocation6], 256  }
  0x26   :  { %141 = vsyncadd [#allocation6], 4294967040  ;;  %v40_v0 = vld [vmem:[#allocation2] sm:$0xff]  ;;  %v41_v1 = vld [vmem:[#allocation2 + $0x8] sm:$0xff]  ;;  %s148_s6 = smov [#allocation7]  }
  0x27   :  { %v42_v2 = vld [vmem:[#allocation5] sm:$0xff]  ;;  %v43_v3 = vld [vmem:[#allocation5 + $0x8] sm:$0xff]  ;;  %s57_s7 = sshll.u32 %s148_s6, 4  ;;  %s58_s7 = int_to_ptr.vmem [resolvable:$true] %s57_s7 }
  0x28   :  { %v44_v4 = vsub.f32 %v40_v0, %v42_v2  ;;  %v45_v5 = vsub.f32 %v41_v1, %v43_v3  ;;  %s116_s8 = scalar_lea.vmem %s58_s7, 128  ;;  %p121_p3 = scmp.lt.s32.totalorder %s58_s7, %s58_s7 }
  0x29   :  { %p117_p2 = scmp.ne.s32.totalorder %s58_s7, %s116_s8  ;;  %p122_p4 = scmp.lt.s32.totalorder %s116_s8, %s116_s8 }
  0x2a   :  { %v46_v6 = vmul.f32 %v44_v4, %v44_v4  ;;  %v47_v7 = vmul.f32 %v45_v5, %v45_v5 }
  0x2b   :  { %p123_p5 = por %p122_p4, %p121_p3 }
  0x2c   :  { %v48_v8 = vadd.f32 %v47_v7, %v46_v6 }
  0x2d   :  { %p124_p6 = pnand %p123_p5, %p117_p2 }
  0x2e   :  { %50 = vst [vmem:[#allocation7] sm:$0xff] %v48_v8 }
  0x2f   :  { %127 = shalt.err (!%p124_p6)
}
  0x30   :  { %s128_s10 = scalar_lea.hbm %s202_s2, 128 }
  0x31   :  { %p129_p7 = scmp.ne.s32.totalorder %s202_s2, %s128_s10  ;;  %p132_p8 = scmp.lt.u32.totalorder %s128_s10, %s202_s2 }
  0x33   :  { %p134_p9 = pnand %p132_p8, %p129_p7 }
  0x35   :  { %137 = shalt.err (!%p134_p9)
}
  0x36   :  { %60 = dma.vmem_to_hbm [thread:$0]  %s58_s7, 128, %s202_s2, [#allocation4]  }
  0x37   :  { %142 = dma.done.wait [#allocation4], 128  }
  0x38   :  { %143 = vsyncadd [#allocation4], 4294967168 }
  0x39   :  { %64 = vsyncpa [#allocation3], 1 }
  0x3a   :  { %65 = vsyncpa [#allocation6], 1 }
  0x3b   :  { %66 = vsyncpa [#allocation4], 1 }

</bundles_post_ra>
